<compile_context>
chip_gen: v6e
topology: v6e:2x2x1
jax: 0.10.0
libtpu: 0.0.40
codegen_flags: <defaults>
</compile_context>

<pallas_src>
import math
import numpy as np
import jax
import jax.numpy as jnp
from jax import lax
from jax.experimental import pallas as pl
from jax.experimental.pallas import tpu as pltpu

TARGET_LEN = 256


# --------------------------------------------------------------------------
# Pallas kernels
# --------------------------------------------------------------------------
def _gru_kernel(x_ref, wih_ref, whh_ref, bih_ref, bhhn_ref, h_ref, ig_ref):
    # x_ref   : (1, W*tile_n, F) bf16, time-major inside the tile
    #           (row t*tile_n + j == window j of this tile at timestep t)
    # wih_ref : (F, 3H) bf16 fused input weights, gate order r|z|n
    # whh_ref : (H, 3H) bf16 fused hidden weights
    # bih_ref : (1, 3H) f32 == b_ih + [b_hr, b_hz, 0]  (r/z hidden bias folded in)
    # bhhn_ref: (1, H)  f32 == b_hn (must stay in-loop: n-gate "r *" term)
    # h_ref   : (tile_n, H) f32 final hidden state (h0 == 0)
    # ig_ref  : (W*tile_n, 3H) VMEM scratch -- hoisted input gates
    tile_n, H = h_ref.shape
    WT = x_ref.shape[1]
    W = WT // tile_n
    H3 = 3 * H

    # Non-recurrent half: ONE big MXU matmul over all timesteps of the tile,
    # one bias add, one scratch store (no per-timestep slicing of x).
    ig = jnp.dot(x_ref[0], wih_ref[...], preferred_element_type=jnp.float32)
    ig = ig + bih_ref[...]                       # (1,3H) broadcast, single add
    ig_ref[...] = ig.astype(ig_ref.dtype)

    whh = whh_ref[...]
    bhh_n = jnp.broadcast_to(bhhn_ref[...], (tile_n, H))   # hoisted out of loop

    def step(t, h):
        off = pl.multiple_of(t * tile_n, tile_n)
        ig_t = ig_ref[pl.ds(off, tile_n), :].astype(jnp.float32)
        hg = jnp.dot(h.astype(whh.dtype), whh,
                     preferred_element_type=jnp.float32)
        r = jax.nn.sigmoid(ig_t[:, :H] + hg[:, :H])
        z = jax.nn.sigmoid(ig_t[:, H:2 * H] + hg[:, H:2 * H])
        n = jnp.tanh(ig_t[:, 2 * H:] + r * (hg[:, 2 * H:] + bhh_n))
        return (1.0 - z) * n + z * h

    h0 = jnp.zeros((tile_n, H), jnp.float32)
    # Bounded unroll: full unroll only for short recurrences (avoids vreg
    # spills / bundle bloat when W is large).
    h_ref[...] = lax.fori_loop(0, W, step, h0, unroll=min(W, 8))


def _proj_pool_kernel(h_ref, wp_ref, bp_ref, res_ref, o_ref):
    # h_ref : (1, T, H)            bf16 padded hidden states
    # wp_ref: (H, tile_f)          bf16 projection weight slab (transposed)
    # bp_ref: (1, tile_f)          f32
    # res_ref: (1, Wb, T, tile_f)  bf16 residual, window-major for the pool mean
    # o_ref : (1, T, tile_f)
    Wb = res_ref.shape[1]
    proj = jnp.dot(h_ref[0], wp_ref[...],
                   preferred_element_type=jnp.float32) + bp_ref[...]
    # adaptive-avg-pool as a window mean over contiguous (T, tile_f) slabs
    acc = res_ref[0, 0].astype(jnp.float32)
    for w in range(1, Wb):                       # Wb is static
        acc = acc + res_ref[0, w].astype(jnp.float32)
    o_ref[0] = (proj + acc * (1.0 / Wb)).astype(o_ref.dtype)


# --------------------------------------------------------------------------
# Parameter init (deterministic, mirrors nn.GRU / nn.Linear shapes)
# --------------------------------------------------------------------------
def init_params(key, num_features):
    H = num_features // 2
    k = jax.random.split(key, 6)
    s = 1.0 / math.sqrt(H)
    return dict(
        weight_ih=jax.random.uniform(k[0], (3 * H, num_features), jnp.float32, -s, s),
        weight_hh=jax.random.uniform(k[1], (3 * H, H), jnp.float32, -s, s),
        bias_ih=jax.random.uniform(k[2], (3 * H,), jnp.float32, -s, s),
        bias_hh=jax.random.uniform(k[3], (3 * H,), jnp.float32, -s, s),
        proj_w=jax.random.uniform(k[4], (num_features, H), jnp.float32, -s, s),
        proj_b=jax.random.uniform(k[5], (num_features,), jnp.float32, -s, s),
    )


def _adaptive_pool_matrix(in_len, out_len):
    # Exact F.adaptive_avg_pool1d index arithmetic as an (out, in) matrix
    # (only used for the ragged / upsampling fallback path, evaluated in XLA).
    P = np.zeros((out_len, in_len), np.float32)
    for i in range(out_len):
        start = (i * in_len) // out_len
        end = -((-(i + 1) * in_len) // out_len)  # ceil((i+1)*in/out)
        P[i, start:end] = 1.0 / (end - start)
    return P


def _round_up(a, b):
    return -(-a // b) * b


def _vmem_config():
    """Per-chip (scoped VMEM limit to request, dtype for the hoisted-gate scratch)."""
    kind = ""
    try:
        kind = jax.devices()[0].device_kind.lower()
    except Exception:
        pass
    if "v7" in kind:        # 64 MiB / TC: leave headroom, halve the ig scratch
        return 48 * 1024 * 1024, jnp.bfloat16
    if "v5" in kind or "v6" in kind:   # 128 MiB parts: spend it on larger tiles
        return 100 * 1024 * 1024, jnp.float32
    return 64 * 1024 * 1024, jnp.float32       # conservative default


def _choose_tile_n(n_pad, W, F, H, ig_bytes, budget):
    """Largest window-tile whose GRU working set fits the VMEM budget."""
    H3 = 3 * H
    fixed = 2 * 2 * (F * H3 + H * H3)            # double-buffered bf16 weights
    for tn in (512, 256, 128, 64, 32, 16, 8):
        if tn > n_pad:
            continue
        per = (2 * W * tn * F * 2                # double-buffered bf16 x slab
               + W * tn * H3 * ig_bytes          # hoisted-gate scratch
               + W * tn * H3 * 4                 # f32 matmul temporaries
               + 2 * tn * H * 4)                 # double-buffered f32 h output
        if fixed + per <= budget:
            return tn
    return 8


def _choose_tile_f(F, Wb, T, budget):
    if F <= 256:
        return F
    for c in (512, 384, 256, 128):
        if F % c == 0 and 4 * Wb * T * c <= budget * 0.6:
            return c
    for c in (512, 384, 256, 128):
        if F % c == 0:
            return c
    return F


# --------------------------------------------------------------------------
# Forward pass
# --------------------------------------------------------------------------
def praxis_compressor_forward(x, attention_mask, params,
                              target_len=TARGET_LEN,
                              compute_dtype=jnp.bfloat16):
    B, S, F = x.shape
    H = F // 2
    H3 = 3 * H
    W = math.ceil(S / target_len)        # window size
    Nw = S // W                          # num windows (torch unfold, step==size)
    N = B * Nw

    vmem_limit, ig_dtype = _vmem_config()
    budget = int(vmem_limit * 0.85)

    # 1) mask + torch-exact unfold scramble (single fused XLA relayout):
    #    windows = (x*mask).unfold(1, W, W)  -> (B, Nw, F, W)
    #    windows.reshape(-1, W, F)           -> row-major reinterpretation
    xm = (x * attention_mask.astype(x.dtype)[:, :, None]).astype(compute_dtype)
    xw = xm[:, :Nw * W, :].reshape(B, Nw, W, F)
    xw = jnp.transpose(xw, (0, 1, 3, 2)).reshape(N, W, F)   # == torch semantics

    # tile sizing (VMEM-budget driven, grid kept >= 2 steps where possible)
    n_pad0 = _round_up(N, 8)
    ig_bytes = jnp.dtype(ig_dtype).itemsize
    tile_n = _choose_tile_n(n_pad0, W, F, H, ig_bytes, budget)
    if tile_n >= n_pad0 and n_pad0 >= 16:        # v7x: feed both TensorCores
        tile_n = _round_up(n_pad0 // 2, 8)
    if ig_dtype != jnp.float32 and tile_n % 16 != 0:
        ig_dtype = jnp.float32                   # keep packed sublane slices aligned
    N_pad = _round_up(N, tile_n)
    grid_n = N_pad // tile_n

    if N_pad != N:
        xw = jnp.pad(xw, ((0, N_pad - N), (0, 0), (0, 0)))
    # tile- and time-major layout: row t*tile_n + j  <-  (window j, timestep t)
    xw = jnp.transpose(xw.reshape(grid_n, tile_n, W, F), (0, 2, 1, 3))
    xw = xw.reshape(grid_n, W * tile_n, F)

    # 2) GRU over each window: fused gate weights (r|z|n), transposed for x @ W^T
    wih_t = jnp.transpose(params["weight_ih"]).astype(compute_dtype)   # (F, 3H)
    whh_t = jnp.transpose(params["weight_hh"]).astype(compute_dtype)   # (H, 3H)
    bih = params["bias_ih"].astype(jnp.float32)
    bhh = params["bias_hh"].astype(jnp.float32)
    b_hoist = (bih + jnp.concatenate(
        [bhh[:H], bhh[H:2 * H], jnp.zeros((H,), jnp.float32)])).reshape(1, H3)
    bhh_n = bhh[2 * H:].reshape(1, H)

    hidden = pl.pallas_call(
        _gru_kernel,
        grid=(grid_n,),
        in_specs=[
            pl.BlockSpec((1, W * tile_n, F), lambda i: (i, 0, 0)),
            pl.BlockSpec((F, H3), lambda i: (0, 0)),
            pl.BlockSpec((H, H3), lambda i: (0, 0)),
            pl.BlockSpec((1, H3), lambda i: (0, 0)),
            pl.BlockSpec((1, H), lambda i: (0, 0)),
        ],
        out_specs=pl.BlockSpec((tile_n, H), lambda i: (i, 0)),
        out_shape=jax.ShapeDtypeStruct((N_pad, H), jnp.float32),
        scratch_shapes=[pltpu.VMEM((W * tile_n, H3), ig_dtype)],
        compiler_params=pltpu.CompilerParams(
            dimension_semantics=("parallel",),
            vmem_limit_bytes=vmem_limit),
    )(xw, wih_t, whh_t, b_hoist, bhh_n)
    # TODO(synk): keep whh resident across the recurrence via explicit
    # matmul_push_rhs/acc_lhs once the fused-gate layout is verified on MXU.

    # 3) pad (front) or crop hidden states to target_len
    hidden = hidden[:N].reshape(B, Nw, H)
    if Nw < target_len:
        pad = jnp.zeros((B, target_len - Nw, H), hidden.dtype)
        hidden = jnp.concatenate([pad, hidden], axis=1)
    else:
        hidden = hidden[:, -target_len:, :]
    hidden = hidden.astype(compute_dtype)

    # 4) residual for adaptive-avg-pool: uniform bins -> (B, Wb, T, F) so each
    #    summand is a contiguous slab; ragged/upsampling -> exact pool matrix.
    if S % target_len == 0 and S >= target_len:
        Wb = S // target_len
        res = jnp.transpose(x.reshape(B, target_len, Wb, F), (0, 2, 1, 3))
    else:
        Wb = 1
        pm = jnp.asarray(_adaptive_pool_matrix(S, target_len))
        res = jnp.einsum("ts,bsf->btf", pm, x).reshape(B, 1, target_len, F)
    res = res.astype(compute_dtype)

    # 5) projection + pooled residual add (gridded over batch and F tiles)
    wp_t = jnp.transpose(params["proj_w"]).astype(compute_dtype)   # (H, F)
    bp = params["proj_b"].reshape(1, F).astype(jnp.float32)
    tile_f = _choose_tile_f(F, Wb, target_len, budget)

    out = pl.pallas_call(
        _proj_pool_kernel,
        grid=(B, F // tile_f),
        in_specs=[
            pl.BlockSpec((1, target_len, H), lambda b, f: (b, 0, 0)),
            pl.BlockSpec((H, tile_f), lambda b, f: (0, f)),
            pl.BlockSpec((1, tile_f), lambda b, f: (0, f)),
            pl.BlockSpec((1, Wb, target_len, tile_f), lambda b, f: (b, 0, 0, f)),
        ],
        out_specs=pl.BlockSpec((1, target_len, tile_f), lambda b, f: (b, 0, f)),
        out_shape=jax.ShapeDtypeStruct((B, target_len, F), x.dtype),
        compiler_params=pltpu.CompilerParams(
            dimension_semantics=("parallel", "parallel"),
            vmem_limit_bytes=vmem_limit),
    )(hidden, wp_t, bp, res)

    new_mask = jnp.ones((B, target_len), x.dtype)
    return out, new_mask


# --------------------------------------------------------------------------
# Pure-JAX f32 reference (mirrors the PyTorch semantics) for validation
# --------------------------------------------------------------------------
def reference_forward(x, attention_mask, params, target_len=TARGET_LEN):
    B, S, F = x.shape
    H = F // 2
    W = math.ceil(S / target_len)
    Nw = S // W
    xm = x * attention_mask.astype(x.dtype)[:, :, None]
    xw = xm[:, :Nw * W, :].reshape(B, Nw, W, F).transpose(0, 1, 3, 2).reshape(B * Nw, W, F)
    wih, whh = params["weight_ih"], params["weight_hh"]
    bih, bhh = params["bias_ih"], params["bias_hh"]
    h = jnp.zeros((B * Nw, H), jnp.float32)
    for t in range(W):
        xt = xw[:, t, :]
        ig = xt @ wih.T + bih
        hg = h @ whh.T + bhh
        r = jax.nn.sigmoid(ig[:, :H] + hg[:, :H])
        z = jax.nn.sigmoid(ig[:, H:2 * H] + hg[:, H:2 * H])
        n = jnp.tanh(ig[:, 2 * H:] + r * hg[:, 2 * H:])
        h = (1.0 - z) * n + z * h
    hidden = h.reshape(B, Nw, H)
    if Nw < target_len:
        hidden = jnp.concatenate(
            [jnp.zeros((B, target_len - Nw, H), hidden.dtype), hidden], axis=1)
    else:
        hidden = hidden[:, -target_len:, :]
    proj = hidden @ params["proj_w"].T + params["proj_b"]
    pm = jnp.asarray(_adaptive_pool_matrix(S, target_len))
    pooled = jnp.einsum("ts,bsf->btf", pm, x)
    return proj + pooled, jnp.ones((B, target_len), x.dtype)


# --------------------------------------------------------------------------
if __name__ == "__main__":
    def run_case(case_key, B, S, F, rtol, atol):
        kx, km, kp = jax.random.split(case_key, 3)
        x = jax.random.normal(kx, (B, S, F), jnp.float32)
        attention_mask = (jax.random.uniform(km, (B, S)) > 0.2).astype(jnp.float32)
        params = init_params(kp, F)

        out, new_mask = praxis_compressor_forward(x, attention_mask, params)
        out = jax.block_until_ready(out)
        new_mask = jax.block_until_ready(new_mask)

        ref_out, ref_mask = reference_forward(x, attention_mask, params)
        assert out.shape == (B, TARGET_LEN, F) and new_mask.shape == (B, TARGET_LEN)
        np.testing.assert_allclose(np.asarray(out), np.asarray(ref_out),
                                   rtol=rtol, atol=atol)
        np.testing.assert_allclose(np.asarray(new_mask), np.asarray(ref_mask))

    key = jax.random.PRNGKey(0)
    k1, k2, k3 = jax.random.split(key, 3)
    # case 1: S < target_len  -> W=1, ragged-pool (matrix) fallback path
    run_case(k1, B=2, S=8, F=32, rtol=2e-2, atol=3e-2)
    # case 2: S = 2*target_len -> W=2 recurrence, 2-step GRU grid, window-mean pool
    run_case(k2, B=2, S=512, F=32, rtol=2e-2, atol=3e-2)
    # case 3: W=4 recurrence, lane-aligned H=128, Wb=4 window mean (bf16 matmuls
    # over longer contractions -> slightly looser tolerance)
    run_case(k3, B=1, S=1024, F=256, rtol=3e-2, atol=5e-2)
    print("KERNEL_OK")
</pallas_src>

<mosaic_0001>
module attributes {stable_mosaic.version = 11 : i64} {
  func.func @_gru_kernel(%arg0: i32, %arg1: memref<1x8x32xbf16, #tpu.memory_space<vmem>>, %arg2: memref<32x48xbf16, #tpu.memory_space<vmem>>, %arg3: memref<16x48xbf16, #tpu.memory_space<vmem>>, %arg4: memref<1x48xf32, #tpu.memory_space<vmem>>, %arg5: memref<1x16xf32, #tpu.memory_space<vmem>>, %arg6: memref<8x16xf32, #tpu.memory_space<vmem>>, %arg7: memref<8x48xf32, #tpu.memory_space<vmem>>) attributes {dimension_semantics = [#tpu.dimension_semantics<parallel>], iteration_bounds = array<i64: 2>, scalar_prefetch = 0 : i64, scratch_operands = 1 : i64, tpu.core_type = #tpu.core_type<tc>, window_params = [{transform_indices = @transform_0, window_bounds = array<i64: 1, 8, 32>}, {pipeline_mode = #tpu.pipeline_mode<synchronous>, transform_indices = @transform_1, window_bounds = array<i64: 32, 48>}, {pipeline_mode = #tpu.pipeline_mode<synchronous>, transform_indices = @transform_2, window_bounds = array<i64: 16, 48>}, {pipeline_mode = #tpu.pipeline_mode<synchronous>, transform_indices = @transform_3, window_bounds = array<i64: 1, 48>}, {pipeline_mode = #tpu.pipeline_mode<synchronous>, transform_indices = @transform_4, window_bounds = array<i64: 1, 16>}, {transform_indices = @transform_5, window_bounds = array<i64: 8, 16>}]} {
    %c0 = arith.constant 0 : index
    %c0_0 = arith.constant 0 : index
    %c0_1 = arith.constant 0 : index
    %0 = vector.load %arg1[%c0, %c0_0, %c0_1] : memref<1x8x32xbf16, #tpu.memory_space<vmem>>, vector<1x8x32xbf16>
    %1 = vector.shape_cast %0 : vector<1x8x32xbf16> to vector<8x32xbf16>
    %c0_2 = arith.constant 0 : index
    %c0_3 = arith.constant 0 : index
    %2 = vector.load %arg2[%c0_2, %c0_3] : memref<32x48xbf16, #tpu.memory_space<vmem>>, vector<32x48xbf16>
    %cst = arith.constant dense<0.000000e+00> : vector<8x48xf32>
    %3 = tpu.matmul %1, %2, %cst {dimension_numbers = #tpu.dot_dimension_numbers<[1], [0], [0], [1], [0, 0, 1, 1], [], []>} : vector<8x32xbf16>, vector<32x48xbf16>, vector<8x48xf32> -> vector<8x48xf32>
    %c0_4 = arith.constant 0 : index
    %c0_5 = arith.constant 0 : index
    %4 = vector.load %arg4[%c0_4, %c0_5] : memref<1x48xf32, #tpu.memory_space<vmem>>, vector<1x48xf32>
    %5 = vector.broadcast %4 : vector<1x48xf32> to vector<8x48xf32>
    %6 = arith.addf %3, %5 : vector<8x48xf32>
    %c0_6 = arith.constant 0 : index
    %c0_7 = arith.constant 0 : index
    %7 = vector.load %arg7[%c0_6, %c0_7] : memref<8x48xf32, #tpu.memory_space<vmem>>, vector<8x48xf32>
    tpu.vector_store %arg7[%c0_6, %c0_7], %6 {strides = array<i32>} : memref<8x48xf32, #tpu.memory_space<vmem>>, vector<8x48xf32>,
    %c0_8 = arith.constant 0 : index
    %c0_9 = arith.constant 0 : index
    %8 = vector.load %arg3[%c0_8, %c0_9] : memref<16x48xbf16, #tpu.memory_space<vmem>>, vector<16x48xbf16>
    %c0_10 = arith.constant 0 : index
    %c0_11 = arith.constant 0 : index
    %9 = vector.load %arg5[%c0_10, %c0_11] : memref<1x16xf32, #tpu.memory_space<vmem>>, vector<1x16xf32>
    %10 = vector.shape_cast %9 : vector<1x16xf32> to vector<1x16xf32>
    %11 = vector.broadcast %10 : vector<1x16xf32> to vector<8x16xf32>
    %cst_12 = arith.constant 0.000000e+00 : f32
    %12 = vector.broadcast %cst_12 : f32 to vector<8x16xf32>
    %c0_i32 = arith.constant 0 : i32
    %c8_i32 = arith.constant 8 : i32
    %13 = arith.muli %c0_i32, %c8_i32 : i32
    %14 = tpu.assume_multiple %13, 8 : i32
    %15 = arith.index_cast %14 : i32 to index
    %c0_13 = arith.constant 0 : index
    %16 = vector.load %arg7[%15, %c0_13] : memref<8x48xf32, #tpu.memory_space<vmem>>, vector<8x48xf32>
    %17 = arith.truncf %12 : vector<8x16xf32> to vector<8x16xbf16>
    %cst_14 = arith.constant dense<0.000000e+00> : vector<8x48xf32>
    %18 = tpu.matmul %17, %8, %cst_14 {dimension_numbers = #tpu.dot_dimension_numbers<[1], [0], [0], [1], [0, 0, 1, 1], [], []>} : vector<8x16xbf16>, vector<16x48xbf16>, vector<8x48xf32> -> vector<8x48xf32>
    %19 = vector.extract_strided_slice %16 {offsets = [0, 0], sizes = [8, 16], strides = [1, 1]} : vector<8x48xf32> to vector<8x16xf32>
    %20 = vector.extract_strided_slice %18 {offsets = [0, 0], sizes = [8, 16], strides = [1, 1]} : vector<8x48xf32> to vector<8x16xf32>
    %21 = arith.addf %19, %20 : vector<8x16xf32>
    %22 = arith.negf %21 : vector<8x16xf32>
    %23 = math.exp %22 : vector<8x16xf32>
    %cst_15 = arith.constant 1.000000e+00 : f32
    %24 = vector.broadcast %cst_15 : f32 to vector<8x16xf32>
    %25 = arith.addf %24, %23 : vector<8x16xf32>
    %26 = arith.divf %24, %25 : vector<8x16xf32>
    %27 = vector.extract_strided_slice %16 {offsets = [0, 16], sizes = [8, 16], strides = [1, 1]} : vector<8x48xf32> to vector<8x16xf32>
    %28 = vector.extract_strided_slice %18 {offsets = [0, 16], sizes = [8, 16], strides = [1, 1]} : vector<8x48xf32> to vector<8x16xf32>
    %29 = arith.addf %27, %28 : vector<8x16xf32>
    %30 = arith.negf %29 : vector<8x16xf32>
    %31 = math.exp %30 : vector<8x16xf32>
    %cst_16 = arith.constant 1.000000e+00 : f32
    %32 = vector.broadcast %cst_16 : f32 to vector<8x16xf32>
    %33 = arith.addf %32, %31 : vector<8x16xf32>
    %34 = arith.divf %32, %33 : vector<8x16xf32>
    %35 = vector.extract_strided_slice %16 {offsets = [0, 32], sizes = [8, 16], strides = [1, 1]} : vector<8x48xf32> to vector<8x16xf32>
    %36 = vector.extract_strided_slice %18 {offsets = [0, 32], sizes = [8, 16], strides = [1, 1]} : vector<8x48xf32> to vector<8x16xf32>
    %37 = arith.addf %36, %11 : vector<8x16xf32>
    %38 = arith.mulf %26, %37 : vector<8x16xf32>
    %39 = arith.addf %35, %38 : vector<8x16xf32>
    %40 = math.tanh %39 : vector<8x16xf32>
    %cst_17 = arith.constant 1.000000e+00 : f32
    %41 = vector.broadcast %cst_17 : f32 to vector<8x16xf32>
    %42 = arith.subf %41, %34 : vector<8x16xf32>
    %43 = arith.mulf %42, %40 : vector<8x16xf32>
    %44 = arith.mulf %34, %12 : vector<8x16xf32>
    %45 = arith.addf %43, %44 : vector<8x16xf32>
    %c1_i32 = arith.constant 1 : i32
    %c0_18 = arith.constant 0 : index
    %c0_19 = arith.constant 0 : index
    %46 = vector.load %arg6[%c0_18, %c0_19] : memref<8x16xf32, #tpu.memory_space<vmem>>, vector<8x16xf32>
    tpu.vector_store %arg6[%c0_18, %c0_19], %45 {strides = array<i32>} : memref<8x16xf32, #tpu.memory_space<vmem>>, vector<8x16xf32>,
    return
  }
  func.func @transform_0(%arg0: i32) -> (i32, i32, i32) {
    %c0_i32 = arith.constant 0 : i32
    %c0_i32_0 = arith.constant 0 : i32
    %c0_i32_1 = arith.constant 0 : i32
    return %arg0, %c0_i32, %c0_i32_0 : i32, i32, i32
  }
  func.func @transform_1(%arg0: i32) -> (i32, i32) {
    %c0_i32 = arith.constant 0 : i32
    %c0_i32_0 = arith.constant 0 : i32
    %c0_i32_1 = arith.constant 0 : i32
    return %c0_i32, %c0_i32_0 : i32, i32
  }
  func.func @transform_2(%arg0: i32) -> (i32, i32) {
    %c0_i32 = arith.constant 0 : i32
    %c0_i32_0 = arith.constant 0 : i32
    %c0_i32_1 = arith.constant 0 : i32
    return %c0_i32, %c0_i32_0 : i32, i32
  }
  func.func @transform_3(%arg0: i32) -> (i32, i32) {
    %c0_i32 = arith.constant 0 : i32
    %c0_i32_0 = arith.constant 0 : i32
    %c0_i32_1 = arith.constant 0 : i32
    return %c0_i32, %c0_i32_0 : i32, i32
  }
  func.func @transform_4(%arg0: i32) -> (i32, i32) {
    %c0_i32 = arith.constant 0 : i32
    %c0_i32_0 = arith.constant 0 : i32
    %c0_i32_1 = arith.constant 0 : i32
    return %c0_i32, %c0_i32_0 : i32, i32
  }
  func.func @transform_5(%arg0: i32) -> (i32, i32) {
    %c0_i32 = arith.constant 0 : i32
    %c0_i32_0 = arith.constant 0 : i32
    return %arg0, %c0_i32 : i32, i32
  }
}

</mosaic_0001>

<bundles_post_ra>
// kernel: tpu_custom_call.1
= control target key start
LH: loop header
LB: loop body
LE: loop exit
PB: predicated region body
PF: predicated region fallthrough
CT: control target
= control target key end

     0   :  { %10 = vsyncpa [#allocation4], 0  ;;  %s1035_s0 = inlined_call_operand.hbm [shape: bf16[2,8,32], index: 0, kind: input, shape index: {}]   ;;  %s1036_s1 = inlined_call_operand.hbm [shape: bf16[32,48], index: 1, kind: input, shape index: {}]   ;;  %s1037_s2 = inlined_call_operand.hbm [shape: bf16[16,48], index: 2, kind: input, shape index: {}]   ;;  %s1038_s3 = inlined_call_operand.vmem [shape: f32[1,48], index: 3, kind: input, shape index: {}]   ;;  %s1039_s4 = inlined_call_operand.vmem [shape: f32[1,16], index: 4, kind: input, shape index: {}]   ;;  %s1040_s5 = inlined_call_operand.hbm [shape: f32[16,16], index: 5, kind: output, shape index: {}]  }
   0x1   :  { %12 = vsyncpa [#allocation4 + $0x1], 0 }
   0x2   :  { %13 = vsyncpa [#allocation7], 0 }
   0x3   :  { %14 = vsyncpa [#allocation5], 0 }
   0x4   :  { %16 = vsyncpa [#allocation5 + $0x1], 0  ;;  %s855_s18 = smov 0   ;;  %s857_s19 = smov 0  }
   0x5   :  { %s859_s20 = smov 0   ;;  %s861_s21 = smov 0  }
   0x6 LB: > { %s876_s22 = sadd.s32 4294967295, %s811_s21   ;;  %s537_s23 = sadd.s32 4294967294, %s811_s21   ;;  %s811_s21 = sphi %s861_s21, %s1062_s21   ;;  %s807_s20 = sphi %s859_s20, %s1061_s20   ;;  %s803_s19 = sphi %s857_s19, %s1060_s19   ;;  %s799_s18 = sphi %s855_s18, %s1059_s18  }
   0x7   : > { %p42_p0 = scmp.ne.s32.totalorder %s803_s19, %s799_s18  ;;  %p1041_p1 = scmp.eq.s32.totalorder %s876_s22, 0 }
   0x8   : > { %p156_p3 = scmp.eq.s32.totalorder %s537_s23, 1  ;;  %p538_p5 = scmp.ge.s32.totalorder %s811_s21, 1 }
   0x9   : > { %p885_p4 = por %p1041_p1, %p42_p0  ;;  %p163_p7 = scmp.lt.s32.totalorder %s811_s21, 3 }
   0xa   : > { %p890_p6 = por %p156_p3, %p42_p0  ;;  %s813_s27 = smov [#allocation6]  }
   0xb   : > { %s1045_s24 = scalar_select %p885_p4, 1, 0 }
   0xc   : > { %s1046_s25 = scalar_select %p890_p6, 1, 0 }
   0xd   : > { %p895_p8 = pnand %p538_p5, %p163_p7  ;;  %s175_s28 = sshll.u32 %s813_s27, 4  ;;  %s176_s28 = int_to_ptr.vmem [resolvable:$true] %s175_s28 }
   0xe   : > { %s814_s30 = smov [#allocation8]   ;;  %s674_s7 = scalar_lea.vmem %s176_s28, 256 }
   0xf   : > { %s1047_s26 = scalar_select %p895_p8, 1, 0 }
  0x10   : > { %p591_p9 = pneg %p895_p8  ;;  %s188_s6 = sshll.u32 %s814_s30, 4  ;;  %s189_s6 = int_to_ptr.vmem [resolvable:$true] %s188_s6 }
  0x11   : > { %p675_p13 = scmp.ne.s32.totalorder %s176_s28, %s674_s7  ;;  %p682_p5 = scmp.lt.s32.totalorder %s176_s28, %s176_s28 }
  0x12   : > { %p904_p11 = pnand %p591_p9, %p1041_p1  ;;  %p683_p7 = scmp.lt.s32.totalorder %s674_s7, %s674_s7 }
  0x14   : > { %p665_p12 = pneg %p904_p11  ;;  %p684_p10 = por %p683_p7, %p682_p5 }
  0x16   : > { %p677_p0 = pnand %p675_p13, %p665_p12 }
  0x18   : > { %p678_p3 = pneg %p677_p0 }
  0x1a   : > { %p685_p9 = pnand %p684_p10, %p678_p3 }
  0x1c   : > { %688 = shalt.err (!%p685_p9)
}
  0x1d   : > { %s815_s8 = smov 64   ;;  %s816_s9 = smov 4  }
  0x1e   : > { %594 = dma.hbm_to_vmem [thread:$0]  (!%p904_p11), %s1036_s1, 256, %s176_s28, [#allocation7], %s815_s8, %s815_s8, %s816_s9  }
  0x1f   : > { %s700_s12 = scalar_lea.vmem %s189_s6, 128  ;;  %p708_p2 = scmp.lt.s32.totalorder %s189_s6, %s189_s6 }
  0x20   : > { %p701_p1 = scmp.ne.s32.totalorder %s189_s6, %s700_s12  ;;  %p709_p6 = scmp.lt.s32.totalorder %s700_s12, %s700_s12 }
  0x22   : > { %p703_p13 = pnand %p701_p1, %p665_p12  ;;  %p710_p5 = por %p709_p6, %p708_p2 }
  0x24   : > { %p704_p0 = pneg %p703_p13 }
  0x26   : > { %p711_p10 = pnand %p710_p5, %p704_p0 }
  0x28   : > { %714 = shalt.err (!%p711_p10)
}
  0x29   : > { %597 = dma.hbm_to_vmem [thread:$0]  (!%p904_p11), %s1037_s2, 128, %s189_s6, [#allocation7], %s815_s8, %s815_s8, %s816_s9  }
  0x2a   : > { %s927_s15 = sadd.s32 1, %s811_s21   ;;  %s29_s16 = sadd.s32 1, %s807_s20 }
  0x2b   : > { %s26_s17 = ssub.s32 %s811_s21, %s927_s15  ;;  %p36_p1 = scmp.ne.s32.totalorder %s807_s20, %s803_s19 }
  0x2c   : > { %p27_p2 = scmp.eq.s32.totalorder %s26_s17, 0  ;;  %p37_p6 = scmp.eq.s32.totalorder %s811_s21, 0 }
  0x2d   : > { %p1049_p12 = scmp.eq.s32.totalorder %s876_s22, 1  ;;  %p608_p7 = scmp.lt.s32.totalorder %s811_s21, 2 }
  0x2e   : > { %s943_s27 = scalar_select %p27_p2, %s807_s20, %s29_s16  }
  0x2f   : > { %p937_p3 = por %p1049_p12, %p36_p1  ;;  %p38_p9 = por %p37_p6, %p36_p1 }
  0x30   : > { %s208_s28 = sand.u32 1, %s807_s20   ;;  %s543_s30 = sshll.u32 %s811_s21, 6 }
  0x31   : > { %s1050_s23 = scalar_select %p937_p3, 1, 0 }
  0x32   : > { %s542_s29 = sshll.u32 %s208_s28, 2  ;;  %s950_s8 = scalar_lea.hbm %s1035_s0, %s543_s30 }
  0x33   : > { %s212_s9 = scalar_lea.vmem [#allocation3], %s542_s29  ;;  %p952_p11 = pnand %p608_p7, %p38_p9 }
  0x34   : > { %s219_s10 = sshll.u32 %s212_s9, 4  ;;  %s209_s12 = scalar_lea.sflag [#allocation4], %s208_s28  ;;  %s220_s10 = int_to_ptr.vmem [resolvable:$true] %s219_s10 }
  0x35   : > { %s715_s13 = scalar_lea.hbm %s950_s8, 64  ;;  %p717_p0 = pneg %p952_p11 }
  0x36   : > { %p716_p13 = scmp.ne.s32.totalorder %s950_s8, %s715_s13  ;;  %s720_s17 = scalar_lea.hbm %s1035_s0, 128 }
  0x37   : > { %p721_p1 = scmp.lt.s32.totalorder %s950_s8, %s1035_s0  ;;  %p722_p2 = scmp.lt.s32.totalorder %s720_s17, %s715_s13 }
  0x38   : > { %p718_p5 = pnand %p717_p0, %p716_p13 }
  0x39   : > { %p723_p6 = por %p722_p2, %p721_p1 }
  0x3a   : > { %p719_p10 = pneg %p718_p5 }
  0x3c   : > { %p724_p12 = pnand %p723_p6, %p719_p10 }
  0x3e   : > { %727 = shalt.err (!%p724_p12)
}
  0x3f   : > { %s728_s6 = scalar_lea.vmem %s220_s10, 64  ;;  %s817_s28 = smov [#allocation3]  }
  0x40   : > { %p729_p7 = scmp.ne.s32.totalorder %s220_s10, %s728_s6  ;;  %s733_s7 = sshll.u32 %s817_s28, 4  ;;  %s734_s7 = int_to_ptr.vmem [resolvable:$false] %s733_s7 }
  0x41   : > { %s735_s9 = scalar_lea.vmem %s734_s7, 128  ;;  %p736_p13 = scmp.lt.s32.totalorder %s220_s10, %s734_s7 }
  0x42   : > { %p731_p9 = pnand %p729_p7, %p717_p0  ;;  %p737_p5 = scmp.lt.s32.totalorder %s735_s9, %s728_s6 }
  0x44   : > { %p732_p3 = pneg %p731_p9  ;;  %p738_p4 = por %p737_p5, %p736_p13 }
  0x46   : > { %p739_p8 = pnand %p738_p4, %p732_p3 }
  0x48   : > { %742 = shalt.err (!%p739_p8)
}
  0x49   : > { %601 = dma.hbm_to_vmem [thread:$0]  (!%p952_p11), %s950_s8, 64, %s220_s10, %s209_s12  }
  0x4a   : > { %p1052_p10 = scmp.ne.s32.totalorder %s1047_s26, 0 }
  0x4b   : > { %s973_s13 = sand.u32 (!%p1052_p10), 1, %s803_s19   ;;  %p1053_p0 = scmp.ne.s32.totalorder (!%p1052_p10), %s1045_s24, 0 }
  0x4c   : > { %228 = sbr.rel (%p1052_p10) target bundleno = 781 (0x30d), region = 40  ;;  %s545_s14 = sshll.u32 (!%p1052_p10), %s973_s13, 2 }
  0x4d   : > { %s231_s16 = scalar_lea.sflag (!%p1052_p10), [#allocation4], %s973_s13  ;;  %s234_s17 = scalar_lea.vmem (!%p1052_p10), [#allocation3], %s545_s14 }
  0x51   : > { %786 = dma.done.wait (%p1053_p0), %s231_s16, 64  }
  0x52   : > { %788 = vsyncadd (%p1053_p0), %s231_s16, 4294967232  ;;  %p1054_p4 = scmp.eq.s32.totalorder %s876_s22, 0 }
  0x54   : > { %790 = dma.done.wait (%p1054_p4), [#allocation7], 384   ;;  %p1055_p8 = pmov %p1054_p4 }
  0x55   : > { %v818_v0 = vmov 0.0   ;;  %vm819_vm0 = vmmov 0   ;;  %v654_v1 = vld [vmem:[#allocation6 + $0x8] sm:$0xff]   ;;  %v655_v2 = vld [vmem:[#allocation8] sm:$0xff]   ;;  %v656_v3 = vld [vmem:[#allocation6] sm:$0xff]   ;;  %s820_s8 = smov 32  }
  0x56   : > { %792 = vsyncadd (%p1055_p8), [#allocation7], 4294966912  ;;  %565 = vmatprep.subr.bf16.mxu0 %v818_v0  ;;  %573 = vmatprep.subr.bf16.mxu1 %v818_v0  ;;  %v553_v4 = vld [vmem:[%s1039_s4] ss:$0 sm:$0xff]  ;;  %v821_v5 = vmov 0   ;;  %vm294_vm1 = vcmask 261120  }
  0x57   : > { %575 = vmatprep.mubr.msk.bf16.mxu1 %vm819_vm0, %v818_v0  ;;  %569 = vmatprep.mubr.msk.bf16.mxu0 %vm819_vm0, %v818_v0  ;;  %v270_v6 = vld [vmem:[%s234_s17] sm:$0xf]  ;;  %v549_v10 = vld [vmem:[%s1038_s3] ss:$0 sm:$0xff]  ;;  %s822_s12 = smov 96   ;;  %vm338_vm2 = vcmask 392192  }
  0x58   : > { %566 = vmatpush3.bf16.msra.mxu0 %v654_v1  ;;  %574 = vmatpush3.bf16.msra.mxu1 %v655_v2  ;;  %s823_s30 = smov 112   ;;  %s548_s29 = sshll.u32 %s973_s13, 3  ;;  %vm355_vm3 = vcmask 130048  }
  0x59   : > { %567 = vmatprep.subr.bf16.mxu0 %v818_v0  ;;  %406 = vrot.lane.b32.xlu0 %v553_v4, %s820_s8  ;;  %s557_s6 = sshll.u32 %s876_s22, 7  ;;  %s268_s28 = scalar_lea.vmem [#allocation9], %s548_s29 }
  0x5a   : > { %s448_s7 = sshll.u32 %s268_s28, 4  ;;  %s998_s16 = scalar_lea.hbm %s1040_s5, %s557_s6  ;;  %s449_s7 = int_to_ptr.vmem [resolvable:$true] %s448_s7 }
  0x5b   : > { %576 = vmatmul.mubr.bf16.vlgmr.msra.gmra.mxu1 %v821_v5  ;;  %s435_s17 = scalar_lea.sflag [#allocation5], %s973_s13  ;;  %s743_s24 = scalar_lea.vmem %s449_s7, 128 }
  0x5c   : > { %568 = vmatpush3.bf16.msra.mxu0 %v656_v3  ;;  %p744_p3 = scmp.ne.s32.totalorder %s449_s7, %s743_s24  ;;  %p1056_p11 = scmp.ne.s32.totalorder %s1050_s23, 0 }
  0x5d   : > { %s824_s26 = smov [#allocation9]  }
  0x5e   : > { %p745_p1 = pnand %p744_p3, %p1056_p11 }
  0x5f   : > { %570 = vmatmul.mubr.msk.bf16.vlgmr.msra.gmra.mxu0 %vm294_vm1, %v270_v6 }
  0x60   : > { %p746_p2 = pneg %p745_p1 }
  0xcb   : > { %v407_v7 = vpop.permute.xlu0 %406 }
 0x11b   : > { %v393_v8 = vpop.f32.mrf.mxu1 }
 0x11c   : > { %v409_v9 = vadd.f32 %v407_v7, %v393_v8 }
 0x11d   : > { %v577_v11 = vpop.f32.mrf.mxu1 }
 0x11e   : > { %411 = vrot.lane.b32.xlu0 %v409_v9, %s822_s12 }
 0x11f   : > { %v332_v12 = vpop.f32.mrf.mxu0  ;;  %v396_v14 = vpop.f32.mrf.mxu1 }
 0x120   : > { %v333_v13 = vadd.f32 %v549_v10, %v332_v12 }
 0x121   : > { %v571_v15 = vpop.f32.mrf.mxu0  ;;  %v578_v16 = vpop.f32.mrf.mxu1 }
 0x122   : > { %339 = vst.msk [vmem:[#allocation2] sm:$0xff] %vm338_vm2, %v333_v13 }
 0x123   : > { %v335_v17 = vpop.f32.mrf.mxu0 }
 0x125   : > { %v572_v18 = vpop.f32.mrf.mxu0 }
 0x129   : > { %v348_v19 = vld [vmem:[#allocation2] sm:$0xff] }
 0x12a   : > { %v399_v20 = vadd.f32 %v393_v8, %v348_v19 }
 0x12c   : > { %v555_v21 = vmul.f32 -1.442695, %v399_v20 }
 0x12e   : > { %657 = vpow2.f32 %v555_v21 }
 0x13b   : > { %v658_v22 = vpop.eup %657 }
 0x13c   : > { %v403_v23 = vadd.f32 1.0, %v658_v22 }
 0x13e   : > { %659 = vrcp.f32 %v403_v23 }
 0x14b   : > { %v660_v24 = vpop.eup %659 }
 0x14c   : > { %v421_v30 = vsub.f32 1.0, %v660_v24  ;;  %v427_v32 = vmul.f32 0.0, %v660_v24 }
 0x190   : > { %v412_v25 = vpop.permute.xlu0 %411 }
 0x191   : > { %v414_v26 = vmul.f32 %v660_v24, %v412_v25 }
 0x193   : > { %416 = vrot.lane.b32.xlu1 %v414_v26, %s820_s8  ;;  %s747_s8 = sshll.u32 %s824_s26, 4  ;;  %s748_s8 = int_to_ptr.vmem [resolvable:$false] %s747_s8 }
 0x194   : > { %s749_s22 = scalar_lea.vmem %s748_s8, 256  ;;  %p750_p6 = scmp.lt.s32.totalorder %s449_s7, %s748_s8 }
 0x195   : > { %p751_p12 = scmp.lt.s32.totalorder %s749_s22, %s743_s24 }
 0x197   : > { %p752_p7 = por %p751_p12, %p750_p6 }
 0x199   : > { %p753_p9 = pnand %p752_p7, %p746_p2 }
 0x205   : > { %v417_v27 = vpop.permute.xlu1 %416 }
 0x206   : > { %v419_v28 = vadd.f32 %v417_v27, %v348_v19 }
 0x208   : > { %661 = vtanh.f32 %v419_v28 }
 0x215   : > { %v662_v29 = vpop.eup %661 }
 0x216   : > { %423 = vrot.lane.b32.xlu1 %v662_v29, %s823_s30 }
 0x288   : > { %v424_v31 = vpop.permute.xlu1 %423 }
 0x289   : > { %v426_v33 = vmul.f32 %v424_v31, %v421_v30 }
 0x28b   : > { %v428_v34 = vadd.f32 %v427_v32, %v426_v33 }
 0x28d   : > { %430 = vrot.lane.b32.xlu0 %v428_v34, %s823_s30 }
 0x2ff   : > { %v431_v35 = vpop.permute.xlu0 %430 }
 0x300   : > { %433 = vst.msk [vmem:[%s268_s28] sm:$0xff] %vm355_vm3, %v431_v35 }
 0x301   : > { %756 = shalt.err (!%p753_p9)
}
 0x302   : > { %s757_s10 = scalar_lea.hbm %s998_s16, 128  ;;  %s761_s12 = scalar_lea.hbm %s1040_s5, 256 }
 0x303   : > { %p758_p13 = scmp.ne.s32.totalorder %s998_s16, %s757_s10  ;;  %p762_p0 = scmp.lt.s32.totalorder %s998_s16, %s1040_s5 }
 0x304   : > { %p763_p4 = scmp.lt.s32.totalorder %s761_s12, %s757_s10 }
 0x305   : > { %p759_p5 = pnand %p758_p13, %p1056_p11 }
 0x306   : > { %p764_p8 = por %p763_p4, %p762_p0 }
 0x307   : > { %p760_p10 = pneg %p759_p5 }
 0x309   : > { %p765_p3 = pnand %p764_p8, %p760_p10 }
 0x30b   : > { %768 = shalt.err (!%p765_p3)
}
 0x30c   : > { %589 = dma.vmem_to_hbm [thread:$0]  (%p1056_p11), %s449_s7, 128, %s998_s16, %s435_s17  }
 0x30d PF: > { %s460_s6 = sand.u32 1, %s799_s18   ;;  %p1057_p1 = scmp.ne.s32.totalorder %s1046_s25, 0 }
 0x30e   : > { %p1058_p2 = scmp.ge.s32.totalorder %s811_s21, 2  ;;  %s461_s28 = scalar_lea.sflag [#allocation5], %s460_s6 }
 0x310   : > { %p603_p6 = pnand %p1058_p2, %p1057_p1 }
 0x312   : > { %p604_p12 = pneg %p603_p6 }
 0x314   : > { %794 = dma.done.wait (%p604_p12), %s461_s28, 128  }
 0x315   : > { %796 = vsyncadd (%p604_p12), %s461_s28, 4294967168  ;;  %p19_p7 = scmp.ge.s32.totalorder %s927_s15, 4   ;;  %s1059_s18 = smov %s803_s19 }
 0x316   : > { %s1060_s19 = smov %s807_s20  ;;  %s1061_s20 = smov %s943_s27 }
 0x317   : > { %s1062_s21 = smov %s927_s15  ;;  %21 = sbr.rel (!%p19_p7) target bundleno = 6 (0x6), region = 93 }
 0x31c   :  { %466 = vsyncpa [#allocation4], 1 }
 0x31d   :  { %468 = vsyncpa [#allocation4 + $0x1], 1 }
 0x31e   :  { %469 = vsyncpa [#allocation7], 1 }
 0x31f   :  { %470 = vsyncpa [#allocation5], 1 }
 0x320   :  { %472 = vsyncpa [#allocation5 + $0x1], 1 }

</bundles_post_ra>
